<compile_context>
chip_gen: v6e
topology: v6e:2x2x1
jax: 0.10.0
libtpu: 0.0.40
codegen_flags: <defaults>
</compile_context>

<pallas_src>
import jax
import jax.numpy as jnp
from jax.experimental import pallas as pl
from jax.experimental.pallas import tpu as pltpu


def _adaln_zero_kernel(x_ref, w_ref, b_ref, o_ref):
    # x_ref: (TB, in_dim)  w_ref: (in_dim, TN)  b_ref: (1, TN)  o_ref: (TB, TN)
    x = x_ref[...].astype(jnp.float32)
    s = x * jax.nn.sigmoid(x)                 # SiLU in f32 (EUP slot; keep f32 on v5e)
    s = s.astype(w_ref.dtype)                 # match MXU operand dtype (bf16 fast path)
    y = jnp.dot(s, w_ref[...], preferred_element_type=jnp.float32)
    o_ref[...] = (y + b_ref[...].astype(jnp.float32)).astype(o_ref.dtype)


def ada_ln_zero_forward(c, weight, bias, *, parts=3, block_batch=256,
                        block_out=512, weight_resident_bytes=8 << 20):
    """Fused AdaLNZero forward.

    c:      (batch, in_dim)                    -- any float dtype (bf16/f32)
    weight: (parts*hidden, in_dim)             -- PyTorch nn.Linear layout
    bias:   (parts*hidden,)
    returns tuple of `parts` arrays, each (batch, hidden), dtype == c.dtype
    """
    assert c.ndim == 2 and weight.ndim == 2
    assert block_out % 128 == 0
    batch, in_dim = c.shape
    out_dim, w_in = weight.shape
    assert w_in == in_dim and out_dim % parts == 0
    hidden = out_dim // parts

    # One-time layout change: (out, in) -> (in, out) so the kernel does a plain
    # (M,K)@(K,N) matmul with no in-kernel transpose.
    w_t = weight.T                      # (in_dim, out_dim), native dtype
    b2d = bias.reshape(1, out_dim)      # native dtype

    out_dtype = c.dtype

    # Batch tiling (parallel axis).
    tb = batch if batch <= block_batch else block_batch
    n_bi = pl.cdiv(batch, tb)

    # out_dim tiling: resident weight when cheap + batch already parallel,
    # otherwise stream lane-dense blocks (gives a >=2-step parallel axis for
    # small batch and overlaps the dominant weight DMA with the MXU).
    w_bytes = in_dim * out_dim * jnp.dtype(w_t.dtype).itemsize
    if out_dim % 128 != 0:
        tn = out_dim                                   # small/odd: keep full extent
    elif n_bi >= 2 and 2 * w_bytes <= weight_resident_bytes:
        tn = out_dim                                   # weight VMEM-resident
    else:
        tn = min(out_dim, block_out)                   # stream over out_dim
    n_nj = pl.cdiv(out_dim, tn)
    grid = (n_bi, n_nj)

    # Explicit VMEM budget: double-buffered tiles + headroom, clamped to v7x physical.
    def _isz(d):
        return jnp.dtype(d).itemsize
    need = 2 * (tb * in_dim * _isz(c.dtype)
                + in_dim * tn * _isz(w_t.dtype)
                + tb * tn * _isz(out_dtype)
                + tn * _isz(b2d.dtype)) + (4 << 20)
    vmem_limit = int(min(max(need, 32 << 20), 64 << 20))

    y = pl.pallas_call(
        _adaln_zero_kernel,
        out_shape=jax.ShapeDtypeStruct((batch, out_dim), out_dtype),
        grid_spec=pltpu.PrefetchScalarGridSpec(
            num_scalar_prefetch=0,
            grid=grid,
            in_specs=[
                pl.BlockSpec((tb, in_dim), lambda i, j: (i, 0)),   # x: batch-tiled
                pl.BlockSpec((in_dim, tn), lambda i, j: (0, j)),   # W^T: resident / N-streamed
                pl.BlockSpec((1, tn), lambda i, j: (0, j)),        # bias
            ],
            out_specs=pl.BlockSpec((tb, tn), lambda i, j: (i, j)),
        ),
        compiler_params=pltpu.CompilerParams(
            dimension_semantics=("parallel", "parallel"),
            vmem_limit_bytes=vmem_limit,
        ),
    )(c, w_t, b2d)

    # torch.chunk(3, dim=-1) equivalent (note: JAX slices are copies, not views;
    # fuse the consumer onto `y` directly if that traffic matters).
    return tuple(y[:, p * hidden:(p + 1) * hidden] for p in range(parts))


def ada_ln_zero_reference(c, weight, bias, *, parts=3):
    """Pure-JAX f32 reference mirroring the PyTorch forward semantics."""
    cf = c.astype(jnp.float32)
    s = cf * jax.nn.sigmoid(cf)
    y = s @ weight.astype(jnp.float32).T + bias.astype(jnp.float32)
    return tuple(jnp.split(y, parts, axis=-1))


def init_ada_ln_zero_params(key, hidden_size, in_dim, parts=3, dtype=jnp.float32):
    """Matches AdaLNZero.init_weight(): weight ~ N(0, 0.02), bias = 0."""
    w = (0.02 * jax.random.normal(key, (parts * hidden_size, in_dim))).astype(dtype)
    b = jnp.zeros((parts * hidden_size,), dtype)
    return w, b


if __name__ == "__main__":
    key = jax.random.PRNGKey(0)
    k1, k2, k3, k4 = jax.random.split(key, 4)

    # ---- Test 1: f32 (PyTorch default dtype), tiny shapes, resident-weight path.
    batch, in_dim, hidden = 8, 64, 32
    c = jax.random.normal(k1, (batch, in_dim), jnp.float32)
    w = 0.02 * jax.random.normal(k2, (3 * hidden, in_dim), jnp.float32)
    b = 0.01 * jax.random.normal(k3, (3 * hidden,), jnp.float32)

    outs = jax.block_until_ready(ada_ln_zero_forward(c, w, b))
    refs = ada_ln_zero_reference(c, w, b)
    assert len(outs) == 3
    for o, r in zip(outs, refs):
        assert o.shape == (batch, hidden)
        assert jnp.allclose(o, r.astype(o.dtype), atol=1e-5, rtol=1e-5), "f32 mismatch"

    # ---- Test 2: bf16 params/activations, exercises the N-streamed grid and
    #              bf16-operand / f32-accumulate MXU path.
    batch, in_dim, hidden = 16, 128, 512      # out_dim = 1536 -> three 512-wide N tiles
    c = jax.random.normal(k4, (batch, in_dim)).astype(jnp.bfloat16)
    w = (0.02 * jax.random.normal(k2, (3 * hidden, in_dim))).astype(jnp.bfloat16)
    b = (0.01 * jax.random.normal(k3, (3 * hidden,))).astype(jnp.bfloat16)

    outs = jax.block_until_ready(ada_ln_zero_forward(c, w, b))
    refs = ada_ln_zero_reference(c, w, b)
    for o, r in zip(outs, refs):
        assert o.shape == (batch, hidden)
        assert o.dtype == jnp.bfloat16
        assert jnp.allclose(o.astype(jnp.float32), r, atol=1e-2, rtol=5e-2), "bf16 mismatch"

    print("KERNEL_OK")
</pallas_src>

<mosaic_0001>
module attributes {stable_mosaic.version = 11 : i64} {
  func.func @_adaln_zero_kernel(%arg0: i32, %arg1: i32, %arg2: memref<8x64xf32, #tpu.memory_space<vmem>>, %arg3: memref<64x96xf32, #tpu.memory_space<vmem>>, %arg4: memref<1x96xf32, #tpu.memory_space<vmem>>, %arg5: memref<8x96xf32, #tpu.memory_space<vmem>>) attributes {dimension_semantics = [#tpu.dimension_semantics<parallel>, #tpu.dimension_semantics<parallel>], iteration_bounds = array<i64: 1, 1>, scalar_prefetch = 0 : i64, scratch_operands = 0 : i64, tpu.core_type = #tpu.core_type<tc>, window_params = [{transform_indices = @transform_0, window_bounds = array<i64: 8, 64>}, {transform_indices = @transform_1, window_bounds = array<i64: 64, 96>}, {transform_indices = @transform_2, window_bounds = array<i64: 1, 96>}, {transform_indices = @transform_3, window_bounds = array<i64: 8, 96>}]} {
    %c0 = arith.constant 0 : index
    %c0_0 = arith.constant 0 : index
    %0 = vector.load %arg2[%c0, %c0_0] : memref<8x64xf32, #tpu.memory_space<vmem>>, vector<8x64xf32>
    %1 = arith.negf %0 : vector<8x64xf32>
    %2 = math.exp %1 : vector<8x64xf32>
    %cst = arith.constant 1.000000e+00 : f32
    %3 = vector.broadcast %cst : f32 to vector<8x64xf32>
    %4 = arith.addf %3, %2 : vector<8x64xf32>
    %5 = arith.divf %3, %4 : vector<8x64xf32>
    %6 = arith.mulf %0, %5 : vector<8x64xf32>
    %c0_1 = arith.constant 0 : index
    %c0_2 = arith.constant 0 : index
    %7 = vector.load %arg3[%c0_1, %c0_2] : memref<64x96xf32, #tpu.memory_space<vmem>>, vector<64x96xf32>
    %cst_3 = arith.constant dense<0.000000e+00> : vector<8x96xf32>
    %8 = tpu.matmul %6, %7, %cst_3 {dimension_numbers = #tpu.dot_dimension_numbers<[1], [0], [0], [1], [0, 0, 1, 1], [], []>} : vector<8x64xf32>, vector<64x96xf32>, vector<8x96xf32> -> vector<8x96xf32>
    %c0_4 = arith.constant 0 : index
    %c0_5 = arith.constant 0 : index
    %9 = vector.load %arg4[%c0_4, %c0_5] : memref<1x96xf32, #tpu.memory_space<vmem>>, vector<1x96xf32>
    %10 = vector.broadcast %9 : vector<1x96xf32> to vector<8x96xf32>
    %11 = arith.addf %8, %10 : vector<8x96xf32>
    %c0_6 = arith.constant 0 : index
    %c0_7 = arith.constant 0 : index
    %12 = vector.load %arg5[%c0_6, %c0_7] : memref<8x96xf32, #tpu.memory_space<vmem>>, vector<8x96xf32>
    tpu.vector_store %arg5[%c0_6, %c0_7], %11 {strides = array<i32>} : memref<8x96xf32, #tpu.memory_space<vmem>>, vector<8x96xf32>,
    return
  }
  func.func @transform_0(%arg0: i32, %arg1: i32) -> (i32, i32) {
    %c0_i32 = arith.constant 0 : i32
    %c0_i32_0 = arith.constant 0 : i32
    return %arg0, %c0_i32 : i32, i32
  }
  func.func @transform_1(%arg0: i32, %arg1: i32) -> (i32, i32) {
    %c0_i32 = arith.constant 0 : i32
    %c0_i32_0 = arith.constant 0 : i32
    return %c0_i32, %arg1 : i32, i32
  }
  func.func @transform_2(%arg0: i32, %arg1: i32) -> (i32, i32) {
    %c0_i32 = arith.constant 0 : i32
    %c0_i32_0 = arith.constant 0 : i32
    return %c0_i32, %arg1 : i32, i32
  }
  func.func @transform_3(%arg0: i32, %arg1: i32) -> (i32, i32) {
    %c0_i32 = arith.constant 0 : i32
    return %arg0, %arg1 : i32, i32
  }
}

</mosaic_0001>

<bundles_post_ra>
// kernel: tpu_custom_call.1
= control target key start
LH: loop header
LB: loop body
LE: loop exit
PB: predicated region body
PF: predicated region fallthrough
CT: control target
= control target key end

     0   :  { %8 = vsyncpa [#allocation3], 0  ;;  %s303_s0 = inlined_call_operand.hbm [shape: f32[8,64], index: 0, kind: input, shape index: {}]   ;;  %s304_s1 = inlined_call_operand.hbm [shape: f32[64,96], index: 1, kind: input, shape index: {}]   ;;  %s305_s2 = inlined_call_operand.vmem [shape: f32[1,96], index: 2, kind: input, shape index: {}]   ;;  %s306_s3 = inlined_call_operand.hbm [shape: f32[8,96], index: 3, kind: output, shape index: {}]  }
   0x1   :  { %9 = vsyncpa [#allocation6], 0 }
   0x2   :  { %10 = vsyncpa [#allocation4], 0  ;;  %s264_s12 = smov [#allocation2]   ;;  %s265_s14 = smov [#allocation5]  }
   0x3   :  { %s17_s13 = sshll.u32 %s264_s12, 4  ;;  %s26_s15 = sshll.u32 %s265_s14, 4  ;;  %s18_s13 = int_to_ptr.vmem [resolvable:$true] %s17_s13  ;;  %s27_s15 = int_to_ptr.vmem [resolvable:$true] %s26_s15 }
   0x4   :  { %s206_s16 = scalar_lea.vmem %s18_s13, 128  ;;  %p211_p1 = scmp.lt.s32.totalorder %s18_s13, %s18_s13 }
   0x5   :  { %p207_p0 = scmp.ne.s32.totalorder %s18_s13, %s206_s16  ;;  %p212_p2 = scmp.lt.s32.totalorder %s206_s16, %s206_s16 }
   0x7   :  { %p213_p3 = por %p212_p2, %p211_p1 }
   0x9   :  { %p214_p4 = pnand %p213_p3, %p207_p0 }
   0xb   :  { %217 = shalt.err (!%p214_p4)
}
   0xc   :  { %20 = dma.hbm_to_vmem [thread:$0]  %s303_s0, 128, %s18_s13, [#allocation3]  }
   0xd   :  { %s226_s19 = scalar_lea.vmem %s27_s15, 1024  ;;  %p231_p6 = scmp.lt.s32.totalorder %s27_s15, %s27_s15 }
   0xe   :  { %p227_p5 = scmp.ne.s32.totalorder %s27_s15, %s226_s19  ;;  %p232_p7 = scmp.lt.s32.totalorder %s226_s19, %s226_s19 }
  0x10   :  { %p233_p8 = por %p232_p7, %p231_p6 }
  0x12   :  { %p234_p9 = pnand %p233_p8, %p227_p5 }
  0x14   :  { %237 = shalt.err (!%p234_p9)
}
  0x15   :  { %s266_s20 = smov 128   ;;  %s267_s21 = smov 8  }
  0x16   :  { %32 = dma.hbm_to_vmem [thread:$0]  %s304_s1, 1024, %s27_s15, [#allocation6], %s266_s20, %s266_s20, %s267_s21  }
  0x17   :  { %258 = dma.done.wait [#allocation3], 128  }
  0x18   :  { %259 = vsyncadd [#allocation3], 4294967168 }
  0x19   :  { %260 = dma.done.wait [#allocation6], 1024  }
  0x1a   :  { %261 = vsyncadd [#allocation6], 4294966272  ;;  %v268_v0 = vmov 0.0   ;;  %vm269_vm0 = vmmov 0   ;;  %v56_v1 = vld [vmem:[#allocation5 + $0x38] sm:$0xff]  ;;  %v55_v2 = vld [vmem:[#allocation5 + $0x30] sm:$0xff] }
  0x1b   :  { %168 = vmatprep.subr.mxu0 %v268_v0  ;;  %184 = vmatprep.mubr.msk.f32.mxu0 %vm269_vm0, %v268_v0  ;;  %v54_v3 = vld [vmem:[#allocation5 + $0x28] sm:$0xff]  ;;  %v41_v4 = vld [vmem:[#allocation2] sm:$0xff]  ;;  %v53_v6 = vld [vmem:[#allocation5 + $0x20] sm:$0xff]  ;;  %vm64_vm1 = vcmask 523264   ;;  %s270_s24 = smov [#allocation7]   ;;  %vm138_vm2 = vcmask 785408  }
  0x1c   :  { %169 = vmatpush3.msra.mxu0 %v56_v1  ;;  %v156_v5 = vmul.f32 -1.442695, %v41_v4  ;;  %v52_v7 = vld [vmem:[#allocation5 + $0x18] sm:$0xff]  ;;  %v51_v8 = vld [vmem:[#allocation5 + $0x10] sm:$0xff]  ;;  %v50_v9 = vld [vmem:[#allocation5 + $0x8] sm:$0xff]  ;;  %s146_s25 = sshll.u32 %s270_s24, 4  ;;  %s147_s25 = int_to_ptr.vmem [resolvable:$true] %s146_s25 }
  0x1d   :  { %170 = vmatprep.subr.mxu0 %v268_v0  ;;  %v49_v10 = vld [vmem:[#allocation5] sm:$0xff]  ;;  %v157_v15 = vld [vmem:[%s305_s2] ss:$0 sm:$0xff]  ;;  %s238_s26 = scalar_lea.vmem %s147_s25, 128  ;;  %p243_p11 = scmp.lt.s32.totalorder %s147_s25, %s147_s25 }
  0x1e   :  { %171 = vmatpush3.msra.mxu0 %v55_v2  ;;  %194 = vpow2.f32 %v156_v5  ;;  %p239_p10 = scmp.ne.s32.totalorder %s147_s25, %s238_s26  ;;  %p244_p12 = scmp.lt.s32.totalorder %s238_s26, %s238_s26 }
  0x1f   :  { %172 = vmatprep.subr.mxu0 %v268_v0 }
  0x20   :  { %173 = vmatpush3.msra.mxu0 %v54_v3  ;;  %p245_p13 = por %p244_p12, %p243_p11 }
  0x21   :  { %174 = vmatprep.subr.mxu0 %v268_v0 }
  0x22   :  { %175 = vmatpush3.msra.mxu0 %v53_v6  ;;  %p246_p0 = pnand %p245_p13, %p239_p10 }
  0x23   :  { %176 = vmatprep.subr.mxu0 %v268_v0 }
  0x24   :  { %177 = vmatpush3.msra.mxu0 %v52_v7 }
  0x25   :  { %178 = vmatprep.subr.mxu0 %v268_v0 }
  0x26   :  { %179 = vmatpush3.msra.mxu0 %v51_v8 }
  0x27   :  { %180 = vmatprep.subr.mxu0 %v268_v0 }
  0x28   :  { %181 = vmatpush3.msra.mxu0 %v50_v9 }
  0x29   :  { %182 = vmatprep.subr.mxu0 %v268_v0 }
  0x2a   :  { %183 = vmatpush3.msra.mxu0 %v49_v10 }
  0x2b   :  { %v195_v11 = vpop.eup %194 }
  0x2c   :  { %v45_v12 = vadd.f32 1.0, %v195_v11 }
  0x2e   :  { %196 = vrcp.f32 %v45_v12 }
  0x3b   :  { %v197_v13 = vpop.eup %196 }
  0x3c   :  { %v48_v14 = vmul.f32 %v197_v13, %v41_v4 }
  0x3e   :  { %185 = vmatmul.mubr.msk.f32.vlgmr.msra.gmra.mxu0 %vm64_vm1, %v48_v14 }
  0xfe   :  { %v134_v16 = vpop.f32.mrf.mxu0 }
  0xff   :  { %v135_v17 = vadd.f32 %v157_v15, %v134_v16 }
 0x100   :  { %v186_v18 = vpop.f32.mrf.mxu0 }
 0x101   :  { %139 = vst.msk [vmem:[#allocation7] sm:$0xff] %vm138_vm2, %v135_v17 }
 0x102   :  { %249 = shalt.err (!%p246_p0)
}
 0x103   :  { %149 = dma.vmem_to_hbm [thread:$0]  %s147_s25, 128, %s306_s3, [#allocation4]  }
 0x104   :  { %262 = dma.done.wait [#allocation4], 128  }
 0x105   :  { %263 = vsyncadd [#allocation4], 4294967168 }
 0x106   :  { %153 = vsyncpa [#allocation3], 1 }
 0x107   :  { %154 = vsyncpa [#allocation6], 1 }
 0x108   :  { %155 = vsyncpa [#allocation4], 1 }

</bundles_post_ra>
